<compile_context>
chip_gen: v7x
topology: tpu7x:2x2x1
jax: 0.10.0
libtpu: 0.0.40
codegen_flags: <defaults>
</compile_context>

<pallas_src>
import functools

import jax
import jax.numpy as jnp
from jax.experimental import pallas as pl
from jax.experimental.pallas import tpu as pltpu


# ----------------------------------------------------------------------------
# Kernels
# ----------------------------------------------------------------------------

def _conv1x1_bn_relu_kernel(x_ref, w_ref, bias_ref, o_ref):
    """1x1 conv + folded-BN bias + ReLU, directly in NCHW layout.

    x_ref:    (1, Cin, tn)   bf16 activation tile (one batch, spatial chunk)
    w_ref:    (Cout, Cin)    bf16 weight, BN scale already folded in
    bias_ref: (Cout, 1)      f32 folded BN bias
    o_ref:    (1, Cout, tn)  output tile (lane dim = spatial -> lane-dense)
    """
    acc = jnp.dot(w_ref[...], x_ref[0],
                  preferred_element_type=jnp.float32)        # (Cout, tn) f32
    y = acc + bias_ref[...]                                   # bias broadcast
    o_ref[0] = jnp.maximum(y, 0.0).astype(o_ref.dtype)


def _gemm_bias_relu_kernel(a_ref, w_ref, bias_ref, o_ref):
    """Generic im2col GEMM + folded-BN bias + ReLU (k > 1 fallback).

    a_ref:    (tm, K)        bf16 im2col patches tile
    w_ref:    (K, Cout_pad)  bf16 weight, BN scale folded in, Cout padded to 128
    bias_ref: (1, Cout_pad)  f32 folded BN bias
    o_ref:    (tm, Cout_pad)
    """
    acc = jnp.dot(a_ref[...], w_ref[...],
                  preferred_element_type=jnp.float32)
    y = acc + bias_ref[...]
    o_ref[...] = jnp.maximum(y, 0.0).astype(o_ref.dtype)


# ----------------------------------------------------------------------------
# Wrapper
# ----------------------------------------------------------------------------

def _round_up(v, m):
    return ((v + m - 1) // m) * m


def _fold_bn(weight, gamma, beta, running_mean, running_var, eps):
    """Eval-mode BN -> per-channel scale folded into weights, plus a bias."""
    inv = gamma / jnp.sqrt(running_var + eps)                 # (Cout,)
    bias = beta - running_mean * inv                          # (Cout,)
    w_scaled = weight * inv[:, None, None, None]              # (Cout,Cin,kH,kW)
    return w_scaled, bias


def _conv1x1_path(x, w_scaled, bias, out_dtype):
    """1x1 conv path: per-batch GEMM in NCHW. No im2col, no transposes."""
    n, cin, h, w = x.shape
    cout = w_scaled.shape[0]
    hw = h * w

    # Free reshape fused with the bf16 cast by XLA (single pass).
    x2 = x.reshape(n, cin, hw).astype(jnp.bfloat16)           # (N, Cin, HW)
    wm = w_scaled.reshape(cout, cin).astype(jnp.bfloat16)     # (Cout, Cin)
    b2 = bias.reshape(cout, 1).astype(jnp.float32)            # (Cout, 1)

    # Large lane-dense spatial tile; ragged tail handled by Pallas masking.
    tn = hw if hw <= 1024 else 1024
    grid = (n, pl.cdiv(hw, tn))

    out = pl.pallas_call(
        _conv1x1_bn_relu_kernel,
        out_shape=jax.ShapeDtypeStruct((n, cout, hw), out_dtype),
        grid_spec=pltpu.PrefetchScalarGridSpec(
            num_scalar_prefetch=0,
            grid=grid,
            in_specs=[
                pl.BlockSpec((1, cin, tn), lambda b, s: (b, 0, s)),
                pl.BlockSpec((cout, cin), lambda b, s: (0, 0)),
                pl.BlockSpec((cout, 1), lambda b, s: (0, 0)),
            ],
            out_specs=pl.BlockSpec((1, cout, tn), lambda b, s: (b, 0, s)),
        ),
        # 2-D parallel grid keeps both v7x TensorCores busy; tiles are small
        # enough to fit comfortably inside the default scoped VMEM on all chips.
        compiler_params=pltpu.CompilerParams(
            dimension_semantics=("parallel", "parallel")),
    )(x2, wm, b2)

    return out.reshape(n, cout, h, w)                         # already NCHW


def _im2col_nchw(x, kh, kw):
    """x: (N, Cin, H, W) -> patches (N*OH*OW, Cin*kh*kw), matching
    weight.reshape(Cout, Cin*kh*kw) ordering."""
    n, cin, h, w = x.shape
    oh, ow = h - kh + 1, w - kw + 1
    cols = []
    for i in range(kh):
        for j in range(kw):
            cols.append(x[:, :, i:i + oh, j:j + ow])          # (N, Cin, OH, OW)
    p = jnp.stack(cols, axis=2)                               # (N,Cin,kh*kw,OH,OW)
    p = p.reshape(n, cin * kh * kw, oh, ow)
    p = p.transpose(0, 2, 3, 1)                               # (N, OH, OW, K)
    return p.reshape(n * oh * ow, cin * kh * kw), (n, oh, ow)


def _conv_kxk_path(x, w_scaled, bias, out_dtype, tm=512):
    """Generic k x k fallback: im2col GEMM with lane-dense (padded) Cout."""
    cout, cin, kh, kw = w_scaled.shape
    patches, (n, oh, ow) = _im2col_nchw(x, kh, kw)            # (M, K)
    m, k = patches.shape

    cout_pad = _round_up(cout, 128)                           # lane-dense stores
    wm = w_scaled.reshape(cout, k).T                          # (K, Cout)
    if cout_pad != cout:
        wm = jnp.pad(wm, ((0, 0), (0, cout_pad - cout)))
        bias = jnp.pad(bias, (0, cout_pad - cout))
    wm = wm.astype(jnp.bfloat16)
    b2 = bias.reshape(1, cout_pad).astype(jnp.float32)
    patches = patches.astype(jnp.bfloat16)

    tm = min(tm, _round_up(m, 8))                             # big M tile
    grid = (pl.cdiv(m, tm),)                                  # no jnp.pad copy

    # TODO(synk): for very large K (Cin*kh*kw >= 1024) add a K reduction grid
    # axis with an f32 VMEM accumulator instead of holding the full weight.
    out_flat = pl.pallas_call(
        _gemm_bias_relu_kernel,
        out_shape=jax.ShapeDtypeStruct((m, cout_pad), out_dtype),
        grid_spec=pltpu.PrefetchScalarGridSpec(
            num_scalar_prefetch=0,
            grid=grid,
            in_specs=[
                pl.BlockSpec((tm, k), lambda i: (i, 0)),
                pl.BlockSpec((k, cout_pad), lambda i: (0, 0)),
                pl.BlockSpec((1, cout_pad), lambda i: (0, 0)),
            ],
            out_specs=pl.BlockSpec((tm, cout_pad), lambda i: (i, 0)),
        ),
        compiler_params=pltpu.CompilerParams(
            dimension_semantics=("parallel",)),
    )(patches, wm, b2)

    out = out_flat[:, :cout].reshape(n, oh, ow, cout)
    # TODO(synk): k>1 could avoid im2col + this NHWC->NCHW transpose entirely
    # by accumulating kh*kw shifted matmuls inside the kernel on an NHWC input.
    return out.transpose(0, 3, 1, 2)                          # (N, Cout, OH, OW)


@functools.partial(jax.jit, static_argnames=("eps",))
def conv_module_forward(x, weight, gamma, beta, running_mean, running_var,
                        eps=1e-5):
    """ConvModule forward: Conv2d(k, bias=False) -> BatchNorm2d(eval) -> ReLU.

    x: (N, Cin, H, W); weight: (Cout, Cin, kH, kW). Returns (N, Cout, OH, OW).
    """
    _, _, kh, kw = weight.shape
    w_scaled, bias = _fold_bn(weight, gamma, beta, running_mean, running_var, eps)
    if kh == 1 and kw == 1:
        return _conv1x1_path(x, w_scaled, bias, x.dtype)
    return _conv_kxk_path(x, w_scaled, bias, x.dtype)


# ----------------------------------------------------------------------------
# Reference + test
# ----------------------------------------------------------------------------

def _reference(x, weight, gamma, beta, running_mean, running_var, eps=1e-5):
    y = jax.lax.conv_general_dilated(
        x, weight, window_strides=(1, 1), padding="VALID",
        dimension_numbers=("NCHW", "OIHW", "NCHW"))
    inv = gamma / jnp.sqrt(running_var + eps)
    y = y * inv[None, :, None, None] + (beta - running_mean * inv)[None, :, None, None]
    return jnp.maximum(y, 0.0)


if __name__ == "__main__":
    key = jax.random.PRNGKey(0)
    k_x, k_w1, k_g, k_b, k_m, k_v, k_w3 = jax.random.split(key, 7)

    N, Cin, H, W = 2, 4, 16, 16
    Cout = 8

    x = jax.random.normal(k_x, (N, Cin, H, W), dtype=jnp.float32)
    gamma = 1.0 + 0.1 * jax.random.normal(k_g, (Cout,), dtype=jnp.float32)
    beta = 0.1 * jax.random.normal(k_b, (Cout,), dtype=jnp.float32)
    running_mean = 0.1 * jax.random.normal(k_m, (Cout,), dtype=jnp.float32)
    running_var = jnp.abs(jax.random.normal(k_v, (Cout,), dtype=jnp.float32)) + 0.5

    # --- 1x1 conv (SegFormer linear_fuse case): direct NCHW GEMM path ------
    w1 = jax.random.normal(k_w1, (Cout, Cin, 1, 1), dtype=jnp.float32) * 0.1
    out1 = jax.block_until_ready(
        conv_module_forward(x, w1, gamma, beta, running_mean, running_var))
    ref1 = _reference(x, w1, gamma, beta, running_mean, running_var)
    assert out1.shape == (N, Cout, H, W)
    # bf16 operands (f32 accumulation) -> compare to the f32 reference with a
    # bf16-appropriate tolerance.
    assert jnp.allclose(out1, ref1, atol=5e-2, rtol=5e-2), "1x1 mismatch vs reference"

    # --- 3x3 conv: generic im2col fallback path -----------------------------
    w3 = jax.random.normal(k_w3, (Cout, Cin, 3, 3), dtype=jnp.float32) * 0.1
    out3 = jax.block_until_ready(
        conv_module_forward(x, w3, gamma, beta, running_mean, running_var))
    ref3 = _reference(x, w3, gamma, beta, running_mean, running_var)
    assert out3.shape == (N, Cout, H - 2, W - 2)
    assert jnp.allclose(out3, ref3, atol=5e-2, rtol=5e-2), "3x3 mismatch vs reference"

    print("KERNEL_OK")
</pallas_src>

<mosaic_0001>
module attributes {stable_mosaic.version = 11 : i64} {
  func.func @_conv1x1_bn_relu_kernel(%arg0: i32, %arg1: i32, %arg2: memref<1x4x256xbf16, #tpu.memory_space<vmem>>, %arg3: memref<8x4xbf16, #tpu.memory_space<vmem>>, %arg4: memref<8x1xf32, #tpu.memory_space<vmem>>, %arg5: memref<1x8x256xf32, #tpu.memory_space<vmem>>) attributes {dimension_semantics = [#tpu.dimension_semantics<parallel>, #tpu.dimension_semantics<parallel>], iteration_bounds = array<i64: 2, 1>, scalar_prefetch = 0 : i64, scratch_operands = 0 : i64, tpu.core_type = #tpu.core_type<tc>, window_params = [{transform_indices = @transform_0, window_bounds = array<i64: 1, 4, 256>}, {pipeline_mode = #tpu.pipeline_mode<synchronous>, transform_indices = @transform_1, window_bounds = array<i64: 8, 4>}, {pipeline_mode = #tpu.pipeline_mode<synchronous>, transform_indices = @transform_2, window_bounds = array<i64: 8, 1>}, {transform_indices = @transform_3, window_bounds = array<i64: 1, 8, 256>}]} {
    %c0 = arith.constant 0 : index
    %c0_0 = arith.constant 0 : index
    %0 = vector.load %arg3[%c0, %c0_0] : memref<8x4xbf16, #tpu.memory_space<vmem>>, vector<8x4xbf16>
    %c0_1 = arith.constant 0 : index
    %c0_2 = arith.constant 0 : index
    %c0_3 = arith.constant 0 : index
    %1 = vector.load %arg2[%c0_1, %c0_2, %c0_3] : memref<1x4x256xbf16, #tpu.memory_space<vmem>>, vector<1x4x256xbf16>
    %2 = vector.shape_cast %1 : vector<1x4x256xbf16> to vector<4x256xbf16>
    %cst = arith.constant dense<0.000000e+00> : vector<8x256xf32>
    %3 = tpu.matmul %0, %2, %cst {dimension_numbers = #tpu.dot_dimension_numbers<[1], [0], [0], [1], [0, 0, 1, 1], [], []>} : vector<8x4xbf16>, vector<4x256xbf16>, vector<8x256xf32> -> vector<8x256xf32>
    %c0_4 = arith.constant 0 : index
    %c0_5 = arith.constant 0 : index
    %4 = vector.load %arg4[%c0_4, %c0_5] : memref<8x1xf32, #tpu.memory_space<vmem>>, vector<8x1xf32>
    %5 = vector.broadcast %4 : vector<8x1xf32> to vector<8x256xf32>
    %6 = arith.addf %3, %5 : vector<8x256xf32>
    %cst_6 = arith.constant 0.000000e+00 : f32
    %7 = vector.broadcast %cst_6 : f32 to vector<8x256xf32>
    %8 = arith.maximumf %6, %7 : vector<8x256xf32>
    %c0_7 = arith.constant 0 : index
    %c0_8 = arith.constant 0 : index
    %c0_9 = arith.constant 0 : index
    %9 = vector.load %arg5[%c0_7, %c0_8, %c0_9] : memref<1x8x256xf32, #tpu.memory_space<vmem>>, vector<1x8x256xf32>
    %10 = vector.shape_cast %9 : vector<1x8x256xf32> to vector<8x256xf32>
    %11 = vector.shape_cast %8 : vector<8x256xf32> to vector<1x8x256xf32>
    tpu.vector_store %arg5[%c0_7, %c0_8, %c0_9], %11 {strides = array<i32>} : memref<1x8x256xf32, #tpu.memory_space<vmem>>, vector<1x8x256xf32>,
    return
  }
  func.func @transform_0(%arg0: i32, %arg1: i32) -> (i32, i32, i32) {
    %c0_i32 = arith.constant 0 : i32
    %c0_i32_0 = arith.constant 0 : i32
    return %arg0, %c0_i32, %arg1 : i32, i32, i32
  }
  func.func @transform_1(%arg0: i32, %arg1: i32) -> (i32, i32) {
    %c0_i32 = arith.constant 0 : i32
    %c0_i32_0 = arith.constant 0 : i32
    %c0_i32_1 = arith.constant 0 : i32
    return %c0_i32, %c0_i32_0 : i32, i32
  }
  func.func @transform_2(%arg0: i32, %arg1: i32) -> (i32, i32) {
    %c0_i32 = arith.constant 0 : i32
    %c0_i32_0 = arith.constant 0 : i32
    %c0_i32_1 = arith.constant 0 : i32
    return %c0_i32, %c0_i32_0 : i32, i32
  }
  func.func @transform_3(%arg0: i32, %arg1: i32) -> (i32, i32, i32) {
    %c0_i32 = arith.constant 0 : i32
    %c0_i32_0 = arith.constant 0 : i32
    return %arg0, %c0_i32, %arg1 : i32, i32, i32
  }
}

</mosaic_0001>

<bundles_post_ra>
// kernel: conv_module_forward.1
= control target key start
LH: loop header
LB: loop body
LE: loop exit
PB: predicated region body
PF: predicated region fallthrough
CT: control target
= control target key end

     0   :  { %s458_s12 = smov 0   ;;  %s460_s13 = smov 0   ;;  %s497_s0 = inlined_call_operand.vmem [shape: bf16[2,4,256], index: 0, kind: input, shape index: {}]   ;;  %s498_s1 = inlined_call_operand.vmem [shape: bf16[8,4], index: 1, kind: input, shape index: {}]   ;;  %s499_s2 = inlined_call_operand.vmem [shape: f32[8,1], index: 2, kind: input, shape index: {}]   ;;  %s500_s3 = inlined_call_operand.vmem [shape: f32[2,8,256], index: 3, kind: output, shape index: {}]  }
   0x1   :  { %s462_s14 = smov 0  }
   0x2 LB: > { %s25_s15 = sadd.s32 1, %s431_s13  ;;  %p375_p0 = scmp.ge.s32.totalorder %s435_s14, 1  ;;  %s435_s14 = sphi %s462_s14, %s13_s14   ;;  %s431_s13 = sphi %s460_s13, %s502_s13   ;;  %s427_s12 = sphi %s458_s12, %s501_s12  }
   0x3   : > { %p27_p1 = scmp.ge.s32.totalorder %s25_s15, 2  ;;  %p158_p2 = scmp.lt.s32.totalorder %s435_s14, 3 }
   0x5   : > { %s504_s15 = smov (%p27_p1, %s25_s15), 0  ;;  %p159_p3 = pnand %p375_p0, %p158_p2 }
   0x6   : > { %p191_p4 = scmp.lt.s32.totalorder (!%p159_p3), %s427_s12, 1  ;;  %v437_v0 = vmov (!%p159_p3), 0   ;;  %v213_v1 = vld [vmem:[%s499_s2] sm:$0xff] (!%p159_p3)  ;;  %vm232_vm0 = vcmask (!%p159_p3), 1041408   ;;  %vm228_vm1 = vcmask (!%p159_p3), 31744  }
   0x7   : > { %162 = sbr.rel (%p159_p3) target bundleno = 242 (0xf2), region = 32  ;;  %271 = vmatprep.mubr.bf16.mxu0 (!%p159_p3), %v437_v0  ;;  %412 = vset.pattern.permute.xlu0 (!%p159_p3), %v437_v0  ;;  %v211_v5 = vld [vmem:[%s498_s1] sm:$0xf] (!%p159_p3) }
   0x8   : > { %216 = vperm.xlu0 (!%p159_p3), %412, %v213_v1  }
   0xe   : > { %s506_s12 = smov (!%p191_p4, %s427_s12), 1 }
   0xf   : > { %s385_s18 = sshll.u32 %s506_s12, 2  ;;  %s386_s24 = sshll.u32 %s506_s12, 4 }
  0x10   : > { %s198_s21 = scalar_lea.vmem %s497_s0, %s385_s18  ;;  %s208_s27 = scalar_lea.vmem %s500_s3, %s386_s24 }
  0x11   : > { %v380_v2 = vld.sshfl [vmem:[%s198_s21] sm:$0x33 pattern:$0x76325410] }
  0x12   : > { %v227_v3 = vcombine.high %v380_v2, %v380_v2  ;;  %v234_v4 = vsel %vm232_vm0, %v380_v2, 0 }
  0x14   : > { %381 = vmatprep.subr.msk.bf16.mxu0 %vm232_vm0, %v227_v3 }
  0x15   : > { %240 = vmatpush1.bf16.msra.mxu0 %v234_v4 }
  0x18   : > { %382 = vmatmul.mubr.msk.bf16.vlgmr.msra.gmra.mrb[0].mxu0 %vm228_vm1, %v211_v5 }
  0x87   : > { %v217_v6 = vpop.permute.xlu0 %216 }
  0xeb   : > { %v273_v7 = vpop.f32.mrb[0].mxu0 }
  0xec   : > { %v274_v8 = vadd.f32 %v273_v7, %v217_v6  ;;  %v275_v9 = vpop.f32.mrb[1].mxu0 }
  0xed   : > { %v276_v10 = vadd.f32 %v275_v9, %v217_v6  ;;  %v277_v11 = vpop.f32.mrb[2].mxu0 }
  0xee   : > { %v280_v12 = vmax.f32 %v274_v8, 0.0  ;;  %v278_v13 = vpop.f32.mrb[3].mxu0 }
  0xef   : > { %v281_v14 = vmax.f32 %v276_v10, 0.0 }
  0xf0   : > { %282 = vst [vmem:[%s208_s27] sm:$0xff] %v280_v12 }
  0xf1   : > { %283 = vst [vmem:[%s208_s27 + $0x8] sm:$0xff] %v281_v14 }
  0xf2 PF: > { %s13_s14 = sadd.s32 1, %s435_s14   ;;  %s501_s12 = smov %s431_s13 }
  0xf3   : > { %p10_p5 = scmp.ge.s32.totalorder %s13_s14, 4   ;;  %s502_s13 = smov %s504_s15 }
  0xf5   :  { %12 = sbr.rel (!%p10_p5) target bundleno = 2 (0x2), region = 62 }

</bundles_post_ra>
